<compile_context>
chip_gen: v6e
topology: v6e:2x2x1
jax: 0.10.0
libtpu: 0.0.40
codegen_flags: <defaults>
</compile_context>

<pallas_src>
import jax
import jax.numpy as jnp
from jax.experimental import pallas as pl
from jax.experimental.pallas import tpu as pltpu

# ---------------- configuration (small synthetic shapes) ----------------
B = 2            # batch_num
F = 8            # frame_num (N frames / cameras per sequence)
C_IN = 3         # image channels
H = W = 16       # image spatial size
PATCH = 8        # non-overlapping "conv" patch size
P = (H // PATCH) * (W // PATCH)     # patches per image = 4
DP = C_IN * PATCH * PATCH           # patch feature dim = 192
C_FEAT = 32      # conv output channels
Z_DIM = 32       # per-frame image feature dim fed to the denoiser
TARGET_DIM = 9   # absT(3) + quaR(4) + logFL(2)  -> pose_encoding_type="absT_quaR_logFL"
HIDDEN = 64      # logical denoiser hidden width
HIDDEN_P = 128   # hidden width padded to full lane width
TEMB = 16        # diffusion time-embedding dim
T_STEPS = 100    # diffusion steps

LANES = 128      # lane-dense slab width for all kernel token I/O
TEMB_OFF = 64    # lane offset where the time embedding sits in the cond rows
BF = B * F       # total frames == total pose tokens (N == F)
T_TOK = BF       # token rows per block in the packed slabs

# ---- packed weight-slab row offsets (all multiples of 16 -> bf16 sublane aligned) ----
WP_R0, WP_R1 = 0, DP                       # patch "conv" weight           (192,128)
WZ_R0, WZ_R1 = WP_R1, WP_R1 + LANES        # z head Wz (rows 0:32 valid)   (128,128)
WZW_R0, WZW_R1 = WZ_R1, WZ_R1 + LANES      # folded Wz @ W1z               (128,128)
W1_R0, W1_R1 = WZW_R1, WZW_R1 + LANES      # W1x rows 0:9, W1t rows 64:80  (128,128)
W2_R0, W2_R1 = W1_R1, W1_R1 + LANES        # hidden->hidden                (128,128)
W3_R0, W3_R1 = W2_R1, W2_R1 + LANES        # hidden->pose (cols 0:9)       (128,128)
W_ROWS = W3_R1                             # 832


def _trunc_normal(key, shape, std=0.02):
    # mimics nn.init.trunc_normal_(std=0.02) of PoseDiffusionModel._init_weights
    return std * jax.random.truncated_normal(key, -2.0, 2.0, shape, jnp.float32)


# =========================================================================
# Fused kernel: feature extractor + diffuser noising + denoiser MLP
#   h      = relu(patches @ Wp + bp)                 (BF*P, 128)   [cols 0:C_FEAT valid]
#   pooled = Pool @ h                                (BF, 128)     per-image mean (Pool built from iotas)
#   z      = pooled @ Wz + bz                        (BF, 128)     [cols 0:Z_DIM valid]
#   xt     = sab * x0 + s1m * noise                  (T, 128)      [cols 0:9 valid]
#   h1     = gelu(xtc @ W1a + pooled @ (Wz@W1z) + b1)   == xt@W1x + temb@W1t + z@W1z + b1
#   h2     = gelu(h1 @ W2 + b2)
#   x0p    = h2 @ W3 + b3                            (T, 128)      [cols 0:9 valid]
# =========================================================================
def _fused_kernel(patches_ref, tok_ref, w_ref, b_ref, out_ref):
    f32, bf16 = jnp.float32, jnp.bfloat16

    # ---- packed weight / bias slices (static row windows) ----
    wp = w_ref[WP_R0:WP_R1, :]        # (DP, 128)  bf16
    wz = w_ref[WZ_R0:WZ_R1, :]        # (128,128)
    wzw1 = w_ref[WZW_R0:WZW_R1, :]    # (128,128)  folded Wz @ W1z
    w1a = w_ref[W1_R0:W1_R1, :]       # (128,128)
    w2 = w_ref[W2_R0:W2_R1, :]        # (128,128)
    w3 = w_ref[W3_R0:W3_R1, :]        # (128,128)

    bp = b_ref[0:1, :]
    bz = b_ref[1:2, :]
    b1 = b_ref[2:3, :]                # already includes bz @ W1z
    b2 = b_ref[3:4, :]
    b3 = b_ref[4:5, :]

    # ---- image feature extractor: patch-conv as one bf16 MXU matmul ----
    h = jnp.dot(patches_ref[...], wp, preferred_element_type=f32) + bp   # (BF*P, 128)
    h = jnp.maximum(h, 0.0)                                              # ReLU
    # per-image mean pooling as an MXU matmul; pooling matrix built from iotas
    row_id = jax.lax.broadcasted_iota(jnp.int32, (BF, BF * P), 0)
    col_id = jax.lax.broadcasted_iota(jnp.int32, (BF, BF * P), 1)
    lo = row_id * P
    pool = jnp.where((col_id >= lo) & (col_id < lo + P), 1.0 / P, 0.0).astype(bf16)
    pooled = jnp.dot(pool, h.astype(bf16), preferred_element_type=f32)   # (BF, 128)
    pooled_b = pooled.astype(bf16)
    z_slab = jnp.dot(pooled_b, wz, preferred_element_type=f32) + bz      # (BF, 128)

    # ---- diffuser q(x_t | x_0) (f32 elementwise path) ----
    x0 = tok_ref[0 * T_TOK:1 * T_TOK, :]
    noise = tok_ref[1 * T_TOK:2 * T_TOK, :]
    cond = tok_ref[2 * T_TOK:3 * T_TOK, :]      # temb in lanes [64:80)
    sab = tok_ref[3 * T_TOK:4 * T_TOK, :]       # sqrt(alpha_bar[t]) broadcast
    s1m = tok_ref[4 * T_TOK:5 * T_TOK, :]       # sqrt(1 - alpha_bar[t]) broadcast
    xt = sab * x0 + s1m * noise                 # (T, 128)
    out_ref[0:T_TOK, :] = xt                    # lane-dense store
    xtc = (xt + cond).astype(bf16)              # pose in lanes 0:9, temb in lanes 64:80

    # ---- denoiser MLP (first layer = two K=128 bf16 dots, z-term folded) ----
    h1 = jnp.dot(xtc, w1a, preferred_element_type=f32)
    h1 = h1 + jnp.dot(pooled_b, wzw1, preferred_element_type=f32)
    # TODO(synk): PyTorch nn.GELU defaults to the exact erf form; tanh approximation used here.
    h1 = jax.nn.gelu(h1 + b1, approximate=True)
    h2 = jax.nn.gelu(
        jnp.dot(h1.astype(bf16), w2, preferred_element_type=f32) + b2,
        approximate=True)
    x0p = jnp.dot(h2.astype(bf16), w3, preferred_element_type=f32) + b3  # (T, 128)
    out_ref[T_TOK:2 * T_TOK, :] = x0p
    out_ref[2 * T_TOK:3 * T_TOK, :] = z_slab


# ---------------- plain-JAX glue ----------------
def time_embedding(t, dim):
    half = dim // 2
    freqs = jnp.exp(-jnp.log(10000.0) * jnp.arange(half, dtype=jnp.float32) / half)
    ang = t[:, None].astype(jnp.float32) * freqs[None, :]
    return jnp.concatenate([jnp.sin(ang), jnp.cos(ang)], axis=-1)


def quaternion_to_matrix(quat):
    # real-first quaternion (w, x, y, z) -> rotation matrix, PyTorch3D convention
    w, x, y, z = quat[..., 0], quat[..., 1], quat[..., 2], quat[..., 3]
    xx, yy, zz = x * x, y * y, z * z
    wx, wy, wz = w * x, w * y, w * z
    xy, xz, yz = x * y, x * z, y * z
    R = jnp.stack([
        1 - 2 * (yy + zz), 2 * (xy - wz),     2 * (xz + wy),
        2 * (xy + wz),     1 - 2 * (xx + zz), 2 * (yz - wx),
        2 * (xz - wy),     2 * (yz + wx),     1 - 2 * (xx + yy)], axis=-1)
    return R.reshape(quat.shape[:-1] + (3, 3))


def pose_encoding_to_camera(pose_encoding):
    # absT_quaR_logFL: [:3] translation, [3:7] quaternion, [7:9] log focal length
    abs_T = pose_encoding[..., :3]
    quat = pose_encoding[..., 3:7]
    quat = quat / (jnp.linalg.norm(quat, axis=-1, keepdims=True) + 1e-8)
    R = quaternion_to_matrix(quat)
    focal = jnp.exp(pose_encoding[..., 7:9])
    # TODO(synk): PyTorch3D PerspectiveCameras object construction has no Pallas/JAX
    # equivalent; returning the camera tensors (R, T, focal_length) instead.
    return {"R": R, "T": abs_T, "focal_length": focal}


def pose_diffusion_forward(image, gt_pose_encoding, params, key, training=True):
    """image: (B, F, 3, H, W); gt_pose_encoding: (B, F, TARGET_DIM)."""
    assert training, "only the training branch is implemented"
    B_, F_ = image.shape[0], image.shape[1]
    bf = B_ * F_
    reshaped_image = image.reshape(bf, *image.shape[2:])

    # glue: NCHW -> non-overlapping patches flattened to (bf*P, C*ph*pw), bf16 MXU operand
    x = reshaped_image.reshape(bf, C_IN, H // PATCH, PATCH, W // PATCH, PATCH)
    patches = jnp.transpose(x, (0, 2, 4, 1, 3, 5)).reshape(bf * P, DP).astype(jnp.bfloat16)

    pose_encoding = gt_pose_encoding.reshape(B_, -1, TARGET_DIM)
    N_ = pose_encoding.shape[1]
    assert N_ == F_, "synthetic model assumes one pose per frame"
    T_tok = B_ * N_

    # GaussianDiffusion training step: sample t, build noising schedule coefficients
    k_t, k_n = jax.random.split(key)
    t = jax.random.randint(k_t, (B_,), 0, T_STEPS)
    noise = jax.random.normal(k_n, pose_encoding.shape, jnp.float32)
    betas = jnp.linspace(1e-4, 0.02, T_STEPS, dtype=jnp.float32)
    alphas_bar = jnp.cumprod(1.0 - betas)
    sab = jnp.sqrt(alphas_bar[t])            # (B,)
    s1m = jnp.sqrt(1.0 - alphas_bar[t])      # (B,)
    temb = time_embedding(t, TEMB)           # (B, TEMB)

    # ---- pack the (5*T, 128) token slab: [x0 | noise | cond(temb) | sab | s1m] ----
    x0_tok = pose_encoding.reshape(T_tok, TARGET_DIM)
    x0_pad = jnp.pad(x0_tok, ((0, 0), (0, LANES - TARGET_DIM)))
    noise_pad = jnp.pad(noise.reshape(T_tok, TARGET_DIM),
                        ((0, 0), (0, LANES - TARGET_DIM)))
    cond_pad = jnp.pad(jnp.repeat(temb, N_, axis=0),
                       ((0, 0), (TEMB_OFF, LANES - TEMB_OFF - TEMB)))
    sab_b = jnp.broadcast_to(jnp.repeat(sab, N_)[:, None], (T_tok, LANES))
    s1m_b = jnp.broadcast_to(jnp.repeat(s1m, N_)[:, None], (T_tok, LANES))
    tok_slab = jnp.concatenate([x0_pad, noise_pad, cond_pad, sab_b, s1m_b], axis=0)

    vmem = pl.BlockSpec(memory_space=pltpu.MemorySpace.VMEM)
    cost = pl.CostEstimate(flops=6_100_000, transcendentals=4_096,
                           bytes_accessed=310_000)
    out_slab = pl.pallas_call(
        _fused_kernel,
        out_shape=jax.ShapeDtypeStruct((3 * T_tok, LANES), jnp.float32),
        in_specs=[vmem] * 4,
        out_specs=vmem,
        cost_estimate=cost,
    )(patches, tok_slab, params["w_slab"], params["b_slab"])

    xt = out_slab[0:T_tok, :TARGET_DIM].reshape(B_, N_, TARGET_DIM)
    x0_pred = out_slab[T_tok:2 * T_tok, :TARGET_DIM].reshape(B_, N_, TARGET_DIM)
    z = out_slab[2 * T_tok:3 * T_tok, :Z_DIM].reshape(B_, F_, Z_DIM)
    loss = jnp.mean((x0_pred - pose_encoding) ** 2)

    diffusion_results = {"x_0_pred": x0_pred, "x_t": xt, "t": t, "loss": loss, "z": z}
    diffusion_results["pred_cameras"] = pose_encoding_to_camera(x0_pred)
    return diffusion_results


def init_params(key):
    ks = jax.random.split(key, 8)
    # logical (PyTorch-equivalent) weights
    wp = _trunc_normal(ks[0], (DP, C_FEAT))
    bp = jnp.zeros((C_FEAT,), jnp.float32)
    wz = _trunc_normal(ks[1], (C_FEAT, Z_DIM))
    bz = jnp.zeros((Z_DIM,), jnp.float32)
    w1x = _trunc_normal(ks[2], (TARGET_DIM, HIDDEN))
    w1z = _trunc_normal(ks[3], (Z_DIM, HIDDEN))
    w1t = _trunc_normal(ks[4], (TEMB, HIDDEN))
    b1 = jnp.zeros((HIDDEN,), jnp.float32)
    w2 = _trunc_normal(ks[5], (HIDDEN, HIDDEN))
    b2 = jnp.zeros((HIDDEN,), jnp.float32)
    w3 = _trunc_normal(ks[6], (HIDDEN, TARGET_DIM))
    b3 = jnp.zeros((TARGET_DIM,), jnp.float32)

    # ---- packed (832, 128) bf16 weight slab ----
    wp_pad = jnp.pad(wp, ((0, 0), (0, LANES - C_FEAT)))                    # (192,128)
    wz128 = jnp.zeros((LANES, LANES), jnp.float32).at[:C_FEAT, :Z_DIM].set(wz)
    wzw1 = jnp.zeros((LANES, HIDDEN_P), jnp.float32).at[:C_FEAT, :HIDDEN].set(wz @ w1z)
    w1a = jnp.zeros((LANES, HIDDEN_P), jnp.float32)
    w1a = w1a.at[:TARGET_DIM, :HIDDEN].set(w1x)
    w1a = w1a.at[TEMB_OFF:TEMB_OFF + TEMB, :HIDDEN].set(w1t)
    w2h = jnp.zeros((HIDDEN_P, HIDDEN_P), jnp.float32).at[:HIDDEN, :HIDDEN].set(w2)
    w3h = jnp.zeros((HIDDEN_P, LANES), jnp.float32).at[:HIDDEN, :TARGET_DIM].set(w3)
    w_slab = jnp.concatenate([wp_pad, wz128, wzw1, w1a, w2h, w3h],
                             axis=0).astype(jnp.bfloat16)                  # (832, 128)
    assert w_slab.shape == (W_ROWS, LANES)

    # ---- packed (8, 128) f32 bias slab (b1 absorbs bz @ W1z) ----
    b1_eff = b1 + bz @ w1z
    b_slab = jnp.zeros((8, LANES), jnp.float32)
    b_slab = b_slab.at[0, :C_FEAT].set(bp)
    b_slab = b_slab.at[1, :Z_DIM].set(bz)
    b_slab = b_slab.at[2, :HIDDEN].set(b1_eff)
    b_slab = b_slab.at[3, :HIDDEN].set(b2)
    b_slab = b_slab.at[4, :TARGET_DIM].set(b3)

    return {"w_slab": w_slab, "b_slab": b_slab}


if __name__ == "__main__":
    key = jax.random.PRNGKey(0)
    k_img, k_pose, k_par, k_fwd = jax.random.split(key, 4)

    image = jax.random.normal(k_img, (B, F, C_IN, H, W), jnp.float32)
    # TODO(synk): camera_to_pose_encoding(gt_cameras) requires a PyTorch3D CamerasBase;
    # synthesize the (B, F, 9) absT_quaR_logFL pose encoding directly instead.
    gt_pose_encoding = jax.random.normal(k_pose, (B, F, TARGET_DIM), jnp.float32)

    params = init_params(k_par)
    out = pose_diffusion_forward(image, gt_pose_encoding, params, k_fwd, training=True)

    jax.block_until_ready(out["x_0_pred"])
    jax.block_until_ready(out["x_t"])
    jax.block_until_ready(out["loss"])
    jax.block_until_ready(out["pred_cameras"]["R"])
    print("KERNEL_OK")
</pallas_src>

<mosaic_0001>
module attributes {stable_mosaic.version = 11 : i64} {
  func.func @_fused_kernel(%arg0: memref<64x192xbf16, #tpu.memory_space<vmem>>, %arg1: memref<80x128xf32, #tpu.memory_space<vmem>>, %arg2: memref<832x128xbf16, #tpu.memory_space<vmem>>, %arg3: memref<8x128xf32, #tpu.memory_space<vmem>>, %arg4: memref<48x128xf32, #tpu.memory_space<vmem>>) attributes {dimension_semantics = [], scalar_prefetch = 0 : i64, scratch_operands = 0 : i64, tpu.core_type = #tpu.core_type<tc>} {
    %c0 = arith.constant 0 : index
    %c0_0 = arith.constant 0 : index
    %0 = vector.load %arg2[%c0, %c0_0] : memref<832x128xbf16, #tpu.memory_space<vmem>>, vector<192x128xbf16>
    %c192 = arith.constant 192 : index
    %c0_1 = arith.constant 0 : index
    %1 = vector.load %arg2[%c192, %c0_1] : memref<832x128xbf16, #tpu.memory_space<vmem>>, vector<128x128xbf16>
    %c320 = arith.constant 320 : index
    %c0_2 = arith.constant 0 : index
    %2 = vector.load %arg2[%c320, %c0_2] : memref<832x128xbf16, #tpu.memory_space<vmem>>, vector<128x128xbf16>
    %c448 = arith.constant 448 : index
    %c0_3 = arith.constant 0 : index
    %3 = vector.load %arg2[%c448, %c0_3] : memref<832x128xbf16, #tpu.memory_space<vmem>>, vector<128x128xbf16>
    %c576 = arith.constant 576 : index
    %c0_4 = arith.constant 0 : index
    %4 = vector.load %arg2[%c576, %c0_4] : memref<832x128xbf16, #tpu.memory_space<vmem>>, vector<128x128xbf16>
    %c704 = arith.constant 704 : index
    %c0_5 = arith.constant 0 : index
    %5 = vector.load %arg2[%c704, %c0_5] : memref<832x128xbf16, #tpu.memory_space<vmem>>, vector<128x128xbf16>
    %c0_6 = arith.constant 0 : index
    %c0_7 = arith.constant 0 : index
    %6 = vector.load %arg3[%c0_6, %c0_7] : memref<8x128xf32, #tpu.memory_space<vmem>>, vector<1x128xf32>
    %c1 = arith.constant 1 : index
    %c0_8 = arith.constant 0 : index
    %7 = vector.load %arg3[%c1, %c0_8] : memref<8x128xf32, #tpu.memory_space<vmem>>, vector<1x128xf32>
    %c2 = arith.constant 2 : index
    %c0_9 = arith.constant 0 : index
    %8 = vector.load %arg3[%c2, %c0_9] : memref<8x128xf32, #tpu.memory_space<vmem>>, vector<1x128xf32>
    %c3 = arith.constant 3 : index
    %c0_10 = arith.constant 0 : index
    %9 = vector.load %arg3[%c3, %c0_10] : memref<8x128xf32, #tpu.memory_space<vmem>>, vector<1x128xf32>
    %c4 = arith.constant 4 : index
    %c0_11 = arith.constant 0 : index
    %10 = vector.load %arg3[%c4, %c0_11] : memref<8x128xf32, #tpu.memory_space<vmem>>, vector<1x128xf32>
    %c0_12 = arith.constant 0 : index
    %c0_13 = arith.constant 0 : index
    %11 = vector.load %arg0[%c0_12, %c0_13] : memref<64x192xbf16, #tpu.memory_space<vmem>>, vector<64x192xbf16>
    %cst = arith.constant dense<0.000000e+00> : vector<64x128xf32>
    %12 = tpu.matmul %11, %0, %cst {dimension_numbers = #tpu.dot_dimension_numbers<[1], [0], [0], [1], [0, 0, 1, 1], [], []>} : vector<64x192xbf16>, vector<192x128xbf16>, vector<64x128xf32> -> vector<64x128xf32>
    %13 = vector.broadcast %6 : vector<1x128xf32> to vector<64x128xf32>
    %14 = arith.addf %12, %13 : vector<64x128xf32>
    %cst_14 = arith.constant 0.000000e+00 : f32
    %15 = vector.broadcast %cst_14 : f32 to vector<64x128xf32>
    %16 = arith.maximumf %14, %15 : vector<64x128xf32>
    %17 = tpu.iota {dimensions = array<i32: 0>} : vector<16x64xi32>
    %18 = tpu.iota {dimensions = array<i32: 1>} : vector<16x64xi32>
    %c4_i32 = arith.constant 4 : i32
    %19 = vector.broadcast %c4_i32 : i32 to vector<16x64xi32>
    %20 = arith.muli %17, %19 : vector<16x64xi32>
    %21 = arith.cmpi sge, %18, %20 : vector<16x64xi32>
    %c4_i32_15 = arith.constant 4 : i32
    %22 = vector.broadcast %c4_i32_15 : i32 to vector<16x64xi32>
    %23 = arith.addi %20, %22 : vector<16x64xi32>
    %24 = arith.cmpi slt, %18, %23 : vector<16x64xi32>
    %25 = arith.andi %21, %24 : vector<16x64xi1>
    %cst_16 = arith.constant 2.500000e-01 : f32
    %cst_17 = arith.constant 0.000000e+00 : f32
    %26 = vector.broadcast %cst_16 : f32 to vector<16x64xf32>
    %27 = vector.broadcast %cst_17 : f32 to vector<16x64xf32>
    %28 = arith.select %25, %26, %27 : vector<16x64xi1>, vector<16x64xf32>
    %29 = arith.truncf %28 : vector<16x64xf32> to vector<16x64xbf16>
    %30 = arith.truncf %16 : vector<64x128xf32> to vector<64x128xbf16>
    %cst_18 = arith.constant dense<0.000000e+00> : vector<16x128xf32>
    %31 = tpu.matmul %29, %30, %cst_18 {dimension_numbers = #tpu.dot_dimension_numbers<[1], [0], [0], [1], [0, 0, 1, 1], [], []>} : vector<16x64xbf16>, vector<64x128xbf16>, vector<16x128xf32> -> vector<16x128xf32>
    %32 = arith.truncf %31 : vector<16x128xf32> to vector<16x128xbf16>
    %cst_19 = arith.constant dense<0.000000e+00> : vector<16x128xf32>
    %33 = tpu.matmul %32, %1, %cst_19 {dimension_numbers = #tpu.dot_dimension_numbers<[1], [0], [0], [1], [0, 0, 1, 1], [], []>} : vector<16x128xbf16>, vector<128x128xbf16>, vector<16x128xf32> -> vector<16x128xf32>
    %34 = vector.broadcast %7 : vector<1x128xf32> to vector<16x128xf32>
    %35 = arith.addf %33, %34 : vector<16x128xf32>
    %c0_20 = arith.constant 0 : index
    %c0_21 = arith.constant 0 : index
    %36 = vector.load %arg1[%c0_20, %c0_21] : memref<80x128xf32, #tpu.memory_space<vmem>>, vector<16x128xf32>
    %c16 = arith.constant 16 : index
    %c0_22 = arith.constant 0 : index
    %37 = vector.load %arg1[%c16, %c0_22] : memref<80x128xf32, #tpu.memory_space<vmem>>, vector<16x128xf32>
    %c32 = arith.constant 32 : index
    %c0_23 = arith.constant 0 : index
    %38 = vector.load %arg1[%c32, %c0_23] : memref<80x128xf32, #tpu.memory_space<vmem>>, vector<16x128xf32>
    %c48 = arith.constant 48 : index
    %c0_24 = arith.constant 0 : index
    %39 = vector.load %arg1[%c48, %c0_24] : memref<80x128xf32, #tpu.memory_space<vmem>>, vector<16x128xf32>
    %c64 = arith.constant 64 : index
    %c0_25 = arith.constant 0 : index
    %40 = vector.load %arg1[%c64, %c0_25] : memref<80x128xf32, #tpu.memory_space<vmem>>, vector<16x128xf32>
    %41 = arith.mulf %39, %36 : vector<16x128xf32>
    %42 = arith.mulf %40, %37 : vector<16x128xf32>
    %43 = arith.addf %41, %42 : vector<16x128xf32>
    %c0_26 = arith.constant 0 : index
    %c0_27 = arith.constant 0 : index
    %44 = vector.load %arg4[%c0_26, %c0_27] : memref<48x128xf32, #tpu.memory_space<vmem>>, vector<16x128xf32>
    tpu.vector_store %arg4[%c0_26, %c0_27], %43 {strides = array<i32>} : memref<48x128xf32, #tpu.memory_space<vmem>>, vector<16x128xf32>,
    %45 = arith.addf %43, %38 : vector<16x128xf32>
    %46 = arith.truncf %45 : vector<16x128xf32> to vector<16x128xbf16>
    %cst_28 = arith.constant dense<0.000000e+00> : vector<16x128xf32>
    %47 = tpu.matmul %46, %3, %cst_28 {dimension_numbers = #tpu.dot_dimension_numbers<[1], [0], [0], [1], [0, 0, 1, 1], [], []>} : vector<16x128xbf16>, vector<128x128xbf16>, vector<16x128xf32> -> vector<16x128xf32>
    %cst_29 = arith.constant dense<0.000000e+00> : vector<16x128xf32>
    %48 = tpu.matmul %32, %2, %cst_29 {dimension_numbers = #tpu.dot_dimension_numbers<[1], [0], [0], [1], [0, 0, 1, 1], [], []>} : vector<16x128xbf16>, vector<128x128xbf16>, vector<16x128xf32> -> vector<16x128xf32>
    %49 = arith.addf %47, %48 : vector<16x128xf32>
    %50 = vector.broadcast %8 : vector<1x128xf32> to vector<16x128xf32>
    %51 = arith.addf %49, %50 : vector<16x128xf32>
    %52 = arith.mulf %51, %51 : vector<16x128xf32>
    %53 = arith.mulf %51, %52 : vector<16x128xf32>
    %cst_30 = arith.constant 4.471500e-02 : f32
    %54 = vector.broadcast %cst_30 : f32 to vector<16x128xf32>
    %55 = arith.mulf %54, %53 : vector<16x128xf32>
    %56 = arith.addf %51, %55 : vector<16x128xf32>
    %cst_31 = arith.constant 0.797884583 : f32
    %57 = vector.broadcast %cst_31 : f32 to vector<16x128xf32>
    %58 = arith.mulf %57, %56 : vector<16x128xf32>
    %59 = math.tanh %58 : vector<16x128xf32>
    %cst_32 = arith.constant 1.000000e+00 : f32
    %60 = vector.broadcast %cst_32 : f32 to vector<16x128xf32>
    %61 = arith.addf %60, %59 : vector<16x128xf32>
    %cst_33 = arith.constant 5.000000e-01 : f32
    %62 = vector.broadcast %cst_33 : f32 to vector<16x128xf32>
    %63 = arith.mulf %62, %61 : vector<16x128xf32>
    %64 = arith.mulf %51, %63 : vector<16x128xf32>
    %65 = arith.truncf %64 : vector<16x128xf32> to vector<16x128xbf16>
    %cst_34 = arith.constant dense<0.000000e+00> : vector<16x128xf32>
    %66 = tpu.matmul %65, %4, %cst_34 {dimension_numbers = #tpu.dot_dimension_numbers<[1], [0], [0], [1], [0, 0, 1, 1], [], []>} : vector<16x128xbf16>, vector<128x128xbf16>, vector<16x128xf32> -> vector<16x128xf32>
    %67 = vector.broadcast %9 : vector<1x128xf32> to vector<16x128xf32>
    %68 = arith.addf %66, %67 : vector<16x128xf32>
    %69 = arith.mulf %68, %68 : vector<16x128xf32>
    %70 = arith.mulf %68, %69 : vector<16x128xf32>
    %cst_35 = arith.constant 4.471500e-02 : f32
    %71 = vector.broadcast %cst_35 : f32 to vector<16x128xf32>
    %72 = arith.mulf %71, %70 : vector<16x128xf32>
    %73 = arith.addf %68, %72 : vector<16x128xf32>
    %cst_36 = arith.constant 0.797884583 : f32
    %74 = vector.broadcast %cst_36 : f32 to vector<16x128xf32>
    %75 = arith.mulf %74, %73 : vector<16x128xf32>
    %76 = math.tanh %75 : vector<16x128xf32>
    %cst_37 = arith.constant 1.000000e+00 : f32
    %77 = vector.broadcast %cst_37 : f32 to vector<16x128xf32>
    %78 = arith.addf %77, %76 : vector<16x128xf32>
    %cst_38 = arith.constant 5.000000e-01 : f32
    %79 = vector.broadcast %cst_38 : f32 to vector<16x128xf32>
    %80 = arith.mulf %79, %78 : vector<16x128xf32>
    %81 = arith.mulf %68, %80 : vector<16x128xf32>
    %82 = arith.truncf %81 : vector<16x128xf32> to vector<16x128xbf16>
    %cst_39 = arith.constant dense<0.000000e+00> : vector<16x128xf32>
    %83 = tpu.matmul %82, %5, %cst_39 {dimension_numbers = #tpu.dot_dimension_numbers<[1], [0], [0], [1], [0, 0, 1, 1], [], []>} : vector<16x128xbf16>, vector<128x128xbf16>, vector<16x128xf32> -> vector<16x128xf32>
    %84 = vector.broadcast %10 : vector<1x128xf32> to vector<16x128xf32>
    %85 = arith.addf %83, %84 : vector<16x128xf32>
    %c16_40 = arith.constant 16 : index
    %c0_41 = arith.constant 0 : index
    %86 = vector.load %arg4[%c16_40, %c0_41] : memref<48x128xf32, #tpu.memory_space<vmem>>, vector<16x128xf32>
    tpu.vector_store %arg4[%c16_40, %c0_41], %85 {strides = array<i32>} : memref<48x128xf32, #tpu.memory_space<vmem>>, vector<16x128xf32>,
    %c32_42 = arith.constant 32 : index
    %c0_43 = arith.constant 0 : index
    %87 = vector.load %arg4[%c32_42, %c0_43] : memref<48x128xf32, #tpu.memory_space<vmem>>, vector<16x128xf32>
    tpu.vector_store %arg4[%c32_42, %c0_43], %35 {strides = array<i32>} : memref<48x128xf32, #tpu.memory_space<vmem>>, vector<16x128xf32>,
    return
  }
}

</mosaic_0001>

<bundles_post_ra>
// kernel: tpu_custom_call.1
= control target key start
LH: loop header
LB: loop body
LE: loop exit
PB: predicated region body
PF: predicated region fallthrough
CT: control target
= control target key end

     0   :  { %9 = vsyncpa [#allocation3], 0  ;;  %s1547_s0 = inlined_call_operand.hbm [shape: bf16[64,192], index: 0, kind: input, shape index: {}]   ;;  %s1548_s1 = inlined_call_operand.hbm [shape: f32[80,128], index: 1, kind: input, shape index: {}]   ;;  %s1549_s2 = inlined_call_operand.hbm [shape: bf16[832,128], index: 2, kind: input, shape index: {}]   ;;  %s1550_s3 = inlined_call_operand.hbm [shape: f32[8,128], index: 3, kind: input, shape index: {}]   ;;  %s1551_s4 = inlined_call_operand.hbm [shape: f32[48,128], index: 4, kind: output, shape index: {}]  }
   0x1   :  { %10 = vsyncpa [#allocation6], 0 }
   0x2   :  { %11 = vsyncpa [#allocation9], 0 }
   0x3   :  { %12 = vsyncpa [#allocation4], 0  ;;  %s1423_s15 = smov [#allocation5]   ;;  %s1424_s17 = smov [#allocation2]  }
   0x4   :  { %s30_s16 = sshll.u32 %s1423_s15, 4  ;;  %s18_s18 = sshll.u32 %s1424_s17, 4  ;;  %s31_s16 = int_to_ptr.vmem [resolvable:$true] %s30_s16  ;;  %s19_s18 = int_to_ptr.vmem [resolvable:$true] %s18_s18 }
   0x5   :  { %s1323_s19 = scalar_lea.vmem %s31_s16, 1280  ;;  %p1328_p1 = scmp.lt.s32.totalorder %s31_s16, %s31_s16 }
   0x6   :  { %p1324_p0 = scmp.ne.s32.totalorder %s31_s16, %s1323_s19  ;;  %p1329_p2 = scmp.lt.s32.totalorder %s1323_s19, %s1323_s19 }
   0x8   :  { %p1330_p3 = por %p1329_p2, %p1328_p1 }
   0xa   :  { %p1331_p4 = pnand %p1330_p3, %p1324_p0 }
   0xc   :  { %1334 = shalt.err (!%p1331_p4)
}
   0xd   :  { %s1425_s20 = smov 128   ;;  %s1426_s21 = smov 8  }
   0xe   :  { %36 = dma.hbm_to_vmem [thread:$0]  %s1548_s1, 1280, %s31_s16, [#allocation6], %s1425_s20, %s1425_s20, %s1426_s21  }
   0xf   :  { %s1343_s24 = scalar_lea.vmem %s19_s18, 1024  ;;  %p1348_p6 = scmp.lt.s32.totalorder %s19_s18, %s19_s18 }
  0x10   :  { %p1344_p5 = scmp.ne.s32.totalorder %s19_s18, %s1343_s24  ;;  %p1349_p7 = scmp.lt.s32.totalorder %s1343_s24, %s1343_s24 }
  0x12   :  { %p1350_p8 = por %p1349_p7, %p1348_p6 }
  0x14   :  { %p1351_p9 = pnand %p1350_p8, %p1344_p5 }
  0x16   :  { %1354 = shalt.err (!%p1351_p9)
}
  0x17   :  { %24 = dma.hbm_to_vmem [thread:$0]  %s1547_s0, 1024, %s19_s18, [#allocation3], %s1425_s20, %s1425_s20, %s1426_s21  }
  0x18   :  { %s1427_s27 = smov [#allocation7]  }
  0x19   :  { %s42_s28 = sshll.u32 %s1427_s27, 4  ;;  %s43_s28 = int_to_ptr.vmem [resolvable:$true] %s42_s28 }
  0x1a   :  { %s1363_s29 = scalar_lea.vmem %s43_s28, 6656  ;;  %p1368_p11 = scmp.lt.s32.totalorder %s43_s28, %s43_s28 }
  0x1b   :  { %p1364_p10 = scmp.ne.s32.totalorder %s43_s28, %s1363_s29  ;;  %p1369_p12 = scmp.lt.s32.totalorder %s1363_s29, %s1363_s29 }
  0x1d   :  { %p1370_p13 = por %p1369_p12, %p1368_p11 }
  0x1f   :  { %p1371_p0 = pnand %p1370_p13, %p1364_p10 }
  0x21   :  { %1374 = shalt.err (!%p1371_p0)
}
  0x22   :  { %s1428_s1 = smov 64   ;;  %s1429_s30 = smov 4  }
  0x23   :  { %48 = dma.hbm_to_vmem [thread:$0]  %s1549_s2, 6656, %s43_s28, [#allocation6], %s1428_s1, %s1428_s1, %s1429_s30  }
  0x24   :  { %s1430_s7 = smov [#allocation8]  }
  0x25   :  { %s55_s8 = sshll.u32 %s1430_s7, 4  ;;  %s56_s8 = int_to_ptr.vmem [resolvable:$true] %s55_s8 }
  0x26   :  { %s1383_s0 = scalar_lea.vmem %s56_s8, 128  ;;  %p1388_p2 = scmp.lt.s32.totalorder %s56_s8, %s56_s8 }
  0x27   :  { %p1384_p1 = scmp.ne.s32.totalorder %s56_s8, %s1383_s0  ;;  %p1389_p3 = scmp.lt.s32.totalorder %s1383_s0, %s1383_s0 }
  0x29   :  { %p1390_p4 = por %p1389_p3, %p1388_p2 }
  0x2b   :  { %p1391_p5 = pnand %p1390_p4, %p1384_p1 }
  0x2d   :  { %1394 = shalt.err (!%p1391_p5)
}
  0x2e   :  { %58 = dma.hbm_to_vmem [thread:$0]  %s1550_s3, 128, %s56_s8, [#allocation9]  }
  0x2f   :  { %1415 = dma.done.wait [#allocation3], 1024  }
  0x30   :  { %1416 = vsyncadd [#allocation3], 4294966272 }
  0x31   :  { %1417 = dma.done.wait [#allocation6], 7936  }
  0x32   :  { %1418 = vsyncadd [#allocation6], 4294959360 }
  0x33   :  { %1419 = dma.done.wait [#allocation9], 128  }
  0x34   :  { %1420 = vsyncadd [#allocation9], 4294967168  ;;  %v1431_v0 = vmov 0   ;;  %v1243_v1 = vld [vmem:[#allocation7 + $0x38] sm:$0xff]   ;;  %v1244_v2 = vld [vmem:[#allocation7 + $0x30] sm:$0xff]   ;;  %vm301_vm0 = vcmask 523264   ;;  %v387_v37 = vlaneseq }
  0x35   :  { %314 = vmatprep.subr.bf16.mxu0 %v1431_v0  ;;  %v1245_v3 = vld [vmem:[#allocation7 + $0x28] sm:$0xff]   ;;  %v1246_v4 = vld [vmem:[#allocation7 + $0x20] sm:$0xff]   ;;  %v1257_v5 = vld [vmem:[#allocation2 + $0x4] ss:$8 sps:$4 sm:$0xff]   ;;  %v1432_v21 = vmov 0.0   ;;  %vm1433_vm1 = vmmov 0  }
  0x36   :  { %315 = vmatpush1.bf16.msra.mxu0 %v1243_v1  ;;  %v1247_v6 = vld [vmem:[#allocation7 + $0x18] sm:$0xff]   ;;  %1020 = vmatprep.mubr.msk.bf16.mxu0 %vm301_vm0, %v1257_v5  ;;  %v1248_v7 = vld [vmem:[#allocation7 + $0x10] sm:$0xff]   ;;  %v1249_v8 = vld [vmem:[#allocation7 + $0x8] sm:$0xff]   ;;  %v388_v40 = vshrl.u32 %v387_v37, 7  ;;  %v391_v56 = vand.u32 127, %v387_v37  ;;  %s1434_s2 = smov [#allocation10]  }
  0x37   :  { %316 = vmatprep.subr.bf16.mxu0 %v1431_v0  ;;  %v1250_v9 = vld [vmem:[#allocation7] sm:$0xff]   ;;  %v1251_v10 = vld [vmem:[#allocation7 + $0x58] sm:$0xff]   ;;  %v1252_v11 = vld [vmem:[#allocation7 + $0x50] sm:$0xff]   ;;  %1119 = vmatprep.subr.bf16.mxu1 %v1432_v21  ;;  %s985_s3 = sshll.u32 %s1434_s2, 4  ;;  %s986_s3 = int_to_ptr.vmem [resolvable:$true] %s985_s3 }
  0x38   :  { %v1253_v12 = vld [vmem:[#allocation7 + $0x48] sm:$0xff]   ;;  %v1254_v13 = vld [vmem:[#allocation7 + $0x40] sm:$0xff]   ;;  %v1255_v14 = vld [vmem:[#allocation2] ss:$8 sps:$4 sm:$0xff]   ;;  %1127 = vmatprep.mubr.msk.bf16.mxu1 %vm1433_vm1, %v1432_v21  ;;  %v389_v43 = vadd.s32 8, %v388_v40  ;;  %v392_v48 = vmul.u32 4, %v388_v40  ;;  %p1400_p7 = scmp.lt.s32.totalorder %s986_s3, %s986_s3 }
  0x39   :  { %v1258_v15 = vld [vmem:[#allocation2 + $0x14] ss:$8 sps:$4 sm:$0xff]   ;;  %v1260_v16 = vld [vmem:[#allocation2 + $0x10] ss:$8 sps:$4 sm:$0xff]   ;;  %v1261_v17 = vld [vmem:[#allocation2 + $0x24] ss:$8 sps:$4 sm:$0xff]  }
  0x3a   :  { %317 = vmatpush1.bf16.msra.mxu0 %v1244_v2  ;;  %v1263_v18 = vld [vmem:[#allocation2 + $0x20] ss:$8 sps:$4 sm:$0xff]   ;;  %v1264_v19 = vld [vmem:[#allocation2 + $0x34] ss:$8 sps:$4 sm:$0xff]   ;;  %v1266_v20 = vld [vmem:[#allocation2 + $0x30] ss:$8 sps:$4 sm:$0xff]   ;;  %vm394_vm2 = vcmp.ge.s32.totalorder %v391_v56, %v392_v48 }
  0x3b   :  { %318 = vmatprep.subr.bf16.mxu0 %v1431_v0  ;;  %v1268_v22 = vld [vmem:[#allocation7 + $0xd8] sm:$0xff]   ;;  %v1270_v23 = vld [vmem:[#allocation7 + $0xd0] sm:$0xff]   ;;  %v1272_v24 = vld [vmem:[#allocation7 + $0xc8] sm:$0xff]   ;;  %v393_v51 = vmul.u32 4, %v389_v43  ;;  %v396_v57 = vadd.s32 4, %v392_v48  ;;  %s1395_s11 = scalar_lea.vmem %s986_s3, 768 }
  0x3c   :  { %v1274_v25 = vld [vmem:[#allocation7 + $0xc0] sm:$0xff]   ;;  %v1276_v26 = vld [vmem:[#allocation7 + $0xb8] sm:$0xff]   ;;  %v1278_v27 = vld [vmem:[#allocation7 + $0xb0] sm:$0xff]   ;;  %p1396_p6 = scmp.ne.s32.totalorder %s986_s3, %s1395_s11  ;;  %p1401_p8 = scmp.lt.s32.totalorder %s1395_s11, %s1395_s11 }
  0x3d   :  { %v999_v44 = vld [vmem:[#allocation8] ss:$0 sm:$0xff]  ;;  %v397_v61 = vadd.s32 4, %v393_v51  ;;  %vm395_vm3 = vcmp.ge.s32.totalorder %v391_v56, %v393_v51  ;;  %vm398_vm4 = vcmp.lt.s32.totalorder %v391_v56, %v396_v57  ;;  %v1284_v48 = vld [vmem:[#allocation7 + $0x110] sm:$0xff]   ;;  %v1287_v51 = vld [vmem:[#allocation7 + $0xf8] sm:$0xff]  }
  0x3e   :  { %319 = vmatpush1.bf16.msra.mxu0 %v1245_v3  ;;  %vm400_vm6 = vmand %vm394_vm2, %vm398_vm4  ;;  %v1293_v57 = vld [vmem:[#allocation7 + $0x148] sm:$0xff]   ;;  %p1402_p9 = por %p1401_p8, %p1400_p7 }
  0x3f   :  { %320 = vmatprep.subr.bf16.mxu0 %v1431_v0  ;;  %vm399_vm5 = vcmp.lt.s32.totalorder %v391_v56, %v397_v61  ;;  %v1292_v56 = vld [vmem:[#allocation7 + $0x150] sm:$0xff]   ;;  %v1297_v61 = vld [vmem:[#allocation7 + $0x128] sm:$0xff]  }
  0x40   :  { %vm401_vm7 = vmand %vm395_vm3, %vm399_vm5  ;;  %p1403_p10 = pnand %p1402_p9, %p1396_p6 }
  0x42   :  { %321 = vmatpush1.bf16.msra.mxu0 %v1246_v4 }
  0x43   :  { %322 = vmatprep.subr.bf16.mxu0 %v1431_v0 }
  0x46   :  { %323 = vmatpush1.bf16.msra.mxu0 %v1247_v6 }
  0x47   :  { %324 = vmatprep.subr.bf16.mxu0 %v1431_v0 }
  0x4a   :  { %325 = vmatpush1.bf16.msra.mxu0 %v1248_v7 }
  0x4b   :  { %326 = vmatprep.subr.bf16.mxu0 %v1431_v0 }
  0x4e   :  { %327 = vmatpush1.bf16.msra.mxu0 %v1249_v8  ;;  %v402_v8 = vsel %vm400_vm6, 0.25, %v1432_v21 }
  0x4f   :  { %328 = vmatprep.subr.bf16.mxu0 %v1431_v0 }
  0x52   :  { %329 = vmatpush1.bf16.msra.mxu0 %v1250_v9  ;;  %v403_v9 = vsel %vm401_vm7, 0.25, %v1432_v21 }
  0x53   :  { %338 = vmatprep.subr.bf16.mxu0 %v1431_v0 }
  0x56   :  { %339 = vmatpush2.bf16.msra.mxu0 %v1251_v10 }
  0x57   :  { %340 = vmatprep.subr.bf16.mxu0 %v1431_v0 }
  0x5a   :  { %341 = vmatpush2.bf16.msra.mxu0 %v1252_v11  ;;  %v404_v11 = vpack.c.bf16 %v403_v9, %v402_v8 }
  0x5b   :  { %342 = vmatprep.subr.bf16.mxu0 %v1431_v0 }
  0x5e   :  { %343 = vmatpush2.bf16.msra.mxu0 %v1253_v12  ;;  %v1267_v12 = vld [vmem:[#allocation7 + $0x98] sm:$0xff]  }
  0x5f   :  { %344 = vmatprep.subr.bf16.mxu0 %v1431_v0 }
  0x62   :  { %345 = vmatpush2.bf16.msra.mxu0 %v1254_v13  ;;  %v1269_v13 = vld [vmem:[#allocation7 + $0x90] sm:$0xff]  }
  0x63   :  { %1151 = vmatprep.subr.bf16.mxu0 %v1432_v21 }
  0x65   :  { %347 = vmatmul.mubr.bf16.vlgmr.msra.gmra.mxu0 %v1255_v14  ;;  %v1271_v14 = vld [vmem:[#allocation7 + $0x88] sm:$0xff]  }
  0x66   :  { %1021 = vmatprep.mubr.msk.bf16.mxu0 %vm301_vm0, %v1258_v15  ;;  %1152 = vmatpush3.bf16.msra.mxu0 %v1268_v22  ;;  %v1273_v15 = vld [vmem:[#allocation7 + $0x80] sm:$0xff]  }
  0x67   :  { %1153 = vmatprep.subr.bf16.mxu0 %v1432_v21  ;;  %v1282_v22 = vld [vmem:[#allocation7 + $0xa0] sm:$0xff]  }
  0x6a   :  { %1154 = vmatpush3.bf16.msra.mxu0 %v1270_v23  ;;  %v547_v23 = vld [vmem:[#allocation5] sm:$0xff] }
  0x6b   :  { %1155 = vmatprep.subr.bf16.mxu0 %v1432_v21 }
  0x6d   :  { %355 = vmatmul.mubr.bf16.gmra.mxu0 %v1260_v16  ;;  %v1275_v16 = vld [vmem:[#allocation7 + $0x78] sm:$0xff]  }
  0x6e   :  { %1022 = vmatprep.mubr.msk.bf16.mxu0 %vm301_vm0, %v1261_v17  ;;  %1156 = vmatpush3.bf16.msra.mxu0 %v1272_v24  ;;  %v1277_v17 = vld [vmem:[#allocation7 + $0x70] sm:$0xff]   ;;  %v548_v24 = vld [vmem:[#allocation5 + $0x8] sm:$0xff] }
  0x6f   :  { %1157 = vmatprep.subr.bf16.mxu0 %v1432_v21 }
  0x72   :  { %1158 = vmatpush3.bf16.msra.mxu0 %v1274_v25  ;;  %v549_v25 = vld [vmem:[#allocation5 + $0x10] sm:$0xff] }
  0x73   :  { %1159 = vmatprep.subr.bf16.mxu0 %v1432_v21 }
  0x75   :  { %363 = vmatmul.mubr.bf16.gmra.mxu0 %v1263_v18  ;;  %v1279_v18 = vld [vmem:[#allocation7 + $0x68] sm:$0xff]  }
  0x76   :  { %1023 = vmatprep.mubr.msk.bf16.mxu0 %vm301_vm0, %v1264_v19  ;;  %1160 = vmatpush3.bf16.msra.mxu0 %v1276_v26  ;;  %v1280_v19 = vld [vmem:[#allocation7 + $0xa8] sm:$0xff]  }
  0x77   :  { %1161 = vmatprep.subr.bf16.mxu0 %v1432_v21  ;;  %v550_v26 = vld [vmem:[#allocation5 + $0x18] sm:$0xff] }
  0x7a   :  { %1162 = vmatpush3.bf16.msra.mxu0 %v1278_v27  ;;  %v553_v27 = vld [vmem:[#allocation5 + $0x30] sm:$0xff] }
  0x7b   :  { %1163 = vmatprep.subr.bf16.mxu0 %v1432_v21 }
  0x7d   :  { %371 = vmatmul.mubr.bf16.gmra.mxu0 %v1266_v20  ;;  %v1281_v20 = vld [vmem:[#allocation7 + $0x60] sm:$0xff]  }
  0x7e   :  { %1167 = vmatprep.mubr.msk.bf16.mxu0 %vm1433_vm1, %v1432_v21  ;;  %1164 = vmatpush3.bf16.msra.mxu0 %v1280_v19 }
  0x7f   :  { %1165 = vmatprep.subr.bf16.mxu0 %v1432_v21 }
  0x82   :  { %1166 = vmatpush3.bf16.msra.mxu0 %v1282_v22 }
  0x83   :  { %1191 = vmatprep.subr.bf16.mxu0 %v1432_v21 }
 0x125   :  { %v348_v28 = vpop.f32.mrf.mxu0 }
 0x126   :  { %v349_v3 = vadd.f32 %v999_v44, %v348_v28  ;;  %v554_v28 = vld [vmem:[#allocation5 + $0x38] sm:$0xff] }
 0x127   :  { %v350_v29 = vpop.f32.mrf.mxu0 }
 0x128   :  { %v379_v7 = vmax.f32 %v349_v3, 0.0  ;;  %v555_v29 = vld [vmem:[#allocation5 + $0x40] sm:$0xff] }
 0x129   :  { %v351_v30 = vpop.f32.mrf.mxu0 }
 0x12a   :  { %v352_v0 = vadd.f32 %v999_v44, %v351_v30  ;;  %v556_v30 = vld [vmem:[#allocation5 + $0x48] sm:$0xff] }
 0x12b   :  { %v353_v31 = vpop.f32.mrf.mxu0 }
 0x12c   :  { %v380_v5 = vmax.f32 %v352_v0, 0.0  ;;  %v557_v31 = vmul.f32 %v553_v27, %v547_v23 }
 0x12d   :  { %v356_v32 = vpop.f32.mrf.mxu0 }
 0x12e   :  { %v357_v62 = vadd.f32 %v999_v44, %v356_v32  ;;  %v405_v10 = vpack.c.bf16 %v380_v5, %v379_v7  ;;  %v558_v32 = vmul.f32 %v554_v28, %v548_v24 }
 0x12f   :  { %v358_v33 = vpop.f32.mrf.mxu0 }
 0x130   :  { %v381_v4 = vmax.f32 %v357_v62, 0.0  ;;  %v559_v33 = vmul.f32 %v555_v29, %v549_v25  ;;  %v1298_v62 = vld [vmem:[#allocation7 + $0x120] sm:$0xff]  }
 0x131   :  { %v359_v34 = vpop.f32.mrf.mxu0 }
 0x132   :  { %v360_v58 = vadd.f32 %v999_v44, %v359_v34  ;;  %v560_v34 = vmul.f32 %v556_v30, %v550_v26  ;;  %v561_v37 = vadd.f32 %v559_v33, %v557_v31 }
 0x133   :  { %v361_v35 = vpop.f32.mrf.mxu0 }
 0x134   :  { %v382_v1 = vmax.f32 %v360_v58, 0.0  ;;  %v551_v35 = vld [vmem:[#allocation5 + $0x20] sm:$0xff]  ;;  %563 = vst [vmem:[#allocation10] sm:$0xff] %v561_v37  ;;  %v1294_v58 = vld [vmem:[#allocation7 + $0x140] sm:$0xff]  }
 0x135   :  { %v364_v36 = vpop.f32.mrf.mxu0 }
 0x136   :  { %v365_v53 = vadd.f32 %v999_v44, %v364_v36  ;;  %v406_v6 = vpack.c.bf16 %v382_v1, %v381_v4  ;;  %v552_v36 = vld [vmem:[#allocation5 + $0x28] sm:$0xff] }
 0x137   :  { %v366_v38 = vpop.f32.mrf.mxu0 }
 0x138   :  { %v383_v63 = vmax.f32 %v365_v53, 0.0  ;;  %v562_v38 = vadd.f32 %v560_v34, %v558_v32  ;;  %v1289_v53 = vld [vmem:[#allocation7 + $0xe8] sm:$0xff]  }
 0x139   :  { %v367_v39 = vpop.f32.mrf.mxu0 }
 0x13a   :  { %v368_v49 = vadd.f32 %v999_v44, %v367_v39  ;;  %564 = vst [vmem:[#allocation10 + $0x8] sm:$0xff] %v562_v38  ;;  %v565_v39 = vadd.f32 %v561_v37, %v551_v35  ;;  %v566_v40 = vadd.f32 %v562_v38, %v552_v36 }
 0x13b   :  { %v369_v41 = vpop.f32.mrf.mxu0 }
 0x13c   :  { %v384_v59 = vmax.f32 %v368_v49, 0.0  ;;  %v567_v41 = vpack.c.bf16 %v566_v40, %v565_v39  ;;  %v1285_v49 = vld [vmem:[#allocation7 + $0x108] sm:$0xff]   ;;  %v1299_v39 = vld [vmem:[#allocation7 + $0x198] sm:$0xff]   ;;  %v1300_v40 = vld [vmem:[#allocation7 + $0x190] sm:$0xff]  }
 0x13d   :  { %v372_v42 = vpop.f32.mrf.mxu0 }
 0x13e   :  { %v373_v46 = vadd.f32 %v999_v44, %v372_v42  ;;  %v407_v2 = vpack.c.bf16 %v384_v59, %v383_v63  ;;  %v1295_v59 = vld [vmem:[#allocation7 + $0x138] sm:$0xff]   ;;  %v1025_v63 = vld [vmem:[#allocation8 + $0x1] ss:$0 sm:$0xff] }
 0x13f   :  { %v374_v45 = vpop.f32.mrf.mxu0 }
 0x140   :  { %v385_v54 = vmax.f32 %v373_v46, 0.0  ;;  %v1283_v45 = vld [vmem:[#allocation7 + $0x118] sm:$0xff]  }
 0x141   :  { %v375_v47 = vpop.f32.mrf.mxu0 }
 0x142   :  { %v376_v50 = vadd.f32 %v999_v44, %v375_v47 }
 0x143   :  { %v377_v52 = vpop.f32.mrf.mxu0 }
 0x144   :  { %v386_v55 = vmax.f32 %v376_v50, 0.0  ;;  %v1286_v50 = vld [vmem:[#allocation7 + $0x100] sm:$0xff]   ;;  %v1288_v52 = vld [vmem:[#allocation7 + $0xf0] sm:$0xff]  }
 0x146   :  { %v408_v60 = vpack.c.bf16 %v386_v55, %v385_v54  ;;  %v1290_v54 = vld [vmem:[#allocation7 + $0xe0] sm:$0xff]   ;;  %v1291_v55 = vld [vmem:[#allocation7 + $0x158] sm:$0xff]  }
 0x148   :  { %1120 = vmatpush3.bf16.msra.mxu1 %v408_v60  ;;  %v1296_v60 = vld [vmem:[#allocation7 + $0x130] sm:$0xff]  }
 0x149   :  { %1121 = vmatprep.subr.bf16.mxu1 %v1432_v21 }
 0x14c   :  { %1122 = vmatpush3.bf16.msra.mxu1 %v407_v2 }
 0x14d   :  { %1123 = vmatprep.subr.bf16.mxu1 %v1432_v21 }
 0x150   :  { %1124 = vmatpush3.bf16.msra.mxu1 %v406_v6 }
 0x151   :  { %1125 = vmatprep.subr.bf16.mxu1 %v1432_v21 }
 0x154   :  { %1126 = vmatpush3.bf16.msra.mxu1 %v405_v10  ;;  %v1050_v10 = vld [vmem:[#allocation8 + $0x2] ss:$0 sm:$0xff] }
 0x155   :  { %1131 = vmatprep.subr.bf16.mxu1 %v1432_v21 }
 0x157   :  { %1128 = vmatmul.mubr.msk.bf16.vlgmr.msra.gmra.mxu1 %vm301_vm0, %v404_v11 }
 0x158   :  { %1132 = vmatpush3.bf16.msra.mxu1 %v1267_v12  ;;  %1147 = vmatprep.mubr.msk.bf16.mxu1 %vm1433_vm1, %v1432_v21 }
 0x159   :  { %1133 = vmatprep.subr.bf16.mxu1 %v1432_v21 }
 0x15c   :  { %1134 = vmatpush3.bf16.msra.mxu1 %v1269_v13 }
 0x15d   :  { %1135 = vmatprep.subr.bf16.mxu1 %v1432_v21 }
 0x160   :  { %1136 = vmatpush3.bf16.msra.mxu1 %v1271_v14 }
 0x161   :  { %1137 = vmatprep.subr.bf16.mxu1 %v1432_v21 }
 0x164   :  { %1138 = vmatpush3.bf16.msra.mxu1 %v1273_v15 }
 0x165   :  { %1139 = vmatprep.subr.bf16.mxu1 %v1432_v21 }
 0x168   :  { %1140 = vmatpush3.bf16.msra.mxu1 %v1275_v16 }
 0x169   :  { %1141 = vmatprep.subr.bf16.mxu1 %v1432_v21 }
 0x16c   :  { %1142 = vmatpush3.bf16.msra.mxu1 %v1277_v17 }
 0x16d   :  { %1143 = vmatprep.subr.bf16.mxu1 %v1432_v21 }
 0x170   :  { %1144 = vmatpush3.bf16.msra.mxu1 %v1279_v18 }
 0x171   :  { %1145 = vmatprep.subr.bf16.mxu1 %v1432_v21 }
 0x174   :  { %1146 = vmatpush3.bf16.msra.mxu1 %v1281_v20 }
 0x175   :  { %1171 = vmatprep.subr.bf16.mxu1 %v1432_v21 }
 0x217   :  { %v446_v42 = vpop.f32.mrf.mxu1 }
 0x219   :  { %v1129_v43 = vpop.f32.mrf.mxu1 }
 0x21a   :  { %v1303_v43 = vld [vmem:[#allocation7 + $0x178] sm:$0xff]  }
 0x21b   :  { %v449_v44 = vpop.f32.mrf.mxu1 }
 0x21c   :  { %v453_v46 = vpack.c.bf16 %v449_v44, %v446_v42  ;;  %v1302_v42 = vld [vmem:[#allocation7 + $0x180] sm:$0xff]   ;;  %v1304_v44 = vld [vmem:[#allocation7 + $0x170] sm:$0xff]  }
 0x21d   :  { %v1130_v47 = vpop.f32.mrf.mxu1 }
 0x21e   :  { %1148 = vmatmul.mubr.bf16.vlgmr.msra.gmra.mxu1 %v453_v46  ;;  %1168 = vmatmul.mubr.bf16.vlgmr.msra.gmra.mxu0 %v453_v46  ;;  %v1306_v46 = vld [vmem:[#allocation7 + $0x160] sm:$0xff]  }
 0x21f   :  { %1172 = vmatpush3.bf16.msra.mxu1 %v1283_v45  ;;  %1187 = vmatprep.mubr.msk.bf16.mxu1 %vm1433_vm1, %v1432_v21  ;;  %v1305_v45 = vld [vmem:[#allocation7 + $0x168] sm:$0xff]   ;;  %v1051_v47 = vld [vmem:[#allocation8 + $0x3] ss:$0 sm:$0xff] }
 0x220   :  { %1173 = vmatprep.subr.bf16.mxu1 %v1432_v21  ;;  %1207 = vmatprep.mubr.msk.bf16.mxu0 %vm1433_vm1, %v1432_v21 }
 0x221   :  { %1192 = vmatpush3.bf16.msra.mxu0 %v1291_v55 }
 0x222   :  { %1193 = vmatprep.subr.bf16.mxu0 %v1432_v21 }
 0x223   :  { %1174 = vmatpush3.bf16.msra.mxu1 %v1284_v48 }
 0x224   :  { %1175 = vmatprep.subr.bf16.mxu1 %v1432_v21 }
 0x225   :  { %1194 = vmatpush3.bf16.msra.mxu0 %v1292_v56 }
 0x226   :  { %1195 = vmatprep.subr.bf16.mxu0 %v1432_v21 }
 0x227   :  { %1176 = vmatpush3.bf16.msra.mxu1 %v1285_v49 }
 0x228   :  { %1177 = vmatprep.subr.bf16.mxu1 %v1432_v21 }
 0x229   :  { %1196 = vmatpush3.bf16.msra.mxu0 %v1293_v57 }
 0x22a   :  { %1197 = vmatprep.subr.bf16.mxu0 %v1432_v21 }
 0x22b   :  { %1178 = vmatpush3.bf16.msra.mxu1 %v1286_v50 }
 0x22c   :  { %1179 = vmatprep.subr.bf16.mxu1 %v1432_v21 }
 0x22d   :  { %1198 = vmatpush3.bf16.msra.mxu0 %v1294_v58 }
 0x22e   :  { %1199 = vmatprep.subr.bf16.mxu0 %v1432_v21 }
 0x22f   :  { %1180 = vmatpush3.bf16.msra.mxu1 %v1287_v51 }
 0x230   :  { %1181 = vmatprep.subr.bf16.mxu1 %v1432_v21 }
 0x231   :  { %1200 = vmatpush3.bf16.msra.mxu0 %v1295_v59 }
 0x232   :  { %1201 = vmatprep.subr.bf16.mxu0 %v1432_v21 }
 0x233   :  { %1182 = vmatpush3.bf16.msra.mxu1 %v1288_v52 }
 0x234   :  { %1183 = vmatprep.subr.bf16.mxu1 %v1432_v21 }
 0x235   :  { %1202 = vmatpush3.bf16.msra.mxu0 %v1296_v60 }
 0x236   :  { %1203 = vmatprep.subr.bf16.mxu0 %v1432_v21 }
 0x237   :  { %1184 = vmatpush3.bf16.msra.mxu1 %v1289_v53 }
 0x238   :  { %1185 = vmatprep.subr.bf16.mxu1 %v1432_v21 }
 0x239   :  { %1204 = vmatpush3.bf16.msra.mxu0 %v1297_v61 }
 0x23a   :  { %1205 = vmatprep.subr.bf16.mxu0 %v1432_v21 }
 0x23b   :  { %1186 = vmatpush3.bf16.msra.mxu1 %v1290_v54 }
 0x23c   :  { %1211 = vmatprep.subr.bf16.mxu1 %v1432_v21 }
 0x23d   :  { %1206 = vmatpush3.bf16.msra.mxu0 %v1298_v62 }
 0x23e   :  { %1188 = vmatmul.mubr.bf16.vlgmr.msra.gmra.mxu1 %v567_v41  ;;  %v1301_v41 = vld [vmem:[#allocation7 + $0x188] sm:$0xff]  }
 0x23f   :  { %1227 = vmatprep.mubr.msk.bf16.mxu1 %vm1433_vm1, %v1432_v21  ;;  %1212 = vmatpush3.bf16.msra.mxu1 %v1299_v39 }
 0x240   :  { %1213 = vmatprep.subr.bf16.mxu1 %v1432_v21 }
 0x243   :  { %1214 = vmatpush3.bf16.msra.mxu1 %v1300_v40 }
 0x244   :  { %1215 = vmatprep.subr.bf16.mxu1 %v1432_v21 }
 0x247   :  { %1216 = vmatpush3.bf16.msra.mxu1 %v1301_v41 }
 0x248   :  { %1217 = vmatprep.subr.bf16.mxu1 %v1432_v21 }
 0x24b   :  { %1218 = vmatpush3.bf16.msra.mxu1 %v1302_v42 }
 0x24c   :  { %1219 = vmatprep.subr.bf16.mxu1 %v1432_v21 }
 0x24f   :  { %1220 = vmatpush3.bf16.msra.mxu1 %v1303_v43 }
 0x250   :  { %1221 = vmatprep.subr.bf16.mxu1 %v1432_v21 }
 0x253   :  { %1222 = vmatpush3.bf16.msra.mxu1 %v1304_v44 }
 0x254   :  { %1223 = vmatprep.subr.bf16.mxu1 %v1432_v21 }
 0x257   :  { %1224 = vmatpush3.bf16.msra.mxu1 %v1305_v45 }
 0x258   :  { %1225 = vmatprep.subr.bf16.mxu1 %v1432_v21 }
 0x25b   :  { %1226 = vmatpush3.bf16.msra.mxu1 %v1306_v46 }
 0x2de   :  { %v540_v0 = vpop.f32.mrf.mxu1  ;;  %v650_v1 = vpop.f32.mrf.mxu0 }
 0x2df   :  { %v541_v2 = vadd.f32 %v1025_v63, %v540_v0 }
 0x2e0   :  { %v1149_v3 = vpop.f32.mrf.mxu1  ;;  %v1169_v4 = vpop.f32.mrf.mxu0 }
 0x2e1   :  { %978 = vst [vmem:[#allocation10 + $0x20] sm:$0xff] %v541_v2 }
 0x2e2   :  { %v543_v5 = vpop.f32.mrf.mxu1  ;;  %v653_v6 = vpop.f32.mrf.mxu0 }
 0x2e3   :  { %v544_v7 = vadd.f32 %v1025_v63, %v543_v5 }
 0x2e4   :  { %v1150_v8 = vpop.f32.mrf.mxu1  ;;  %v1170_v9 = vpop.f32.mrf.mxu0 }
 0x2e5   :  { %979 = vst [vmem:[#allocation10 + $0x28] sm:$0xff] %v544_v7  ;;  %v1060_v8 = vld [vmem:[#allocation8 + $0x4] ss:$0 sm:$0xff] }
 0x2fe   :  { %v739_v11 = vpop.f32.mrf.mxu1 }
 0x2ff   :  { %v740_v12 = vadd.f32 %v739_v11, %v650_v1 }
 0x300   :  { %v1189_v13 = vpop.f32.mrf.mxu1 }
 0x301   :  { %v750_v14 = vadd.f32 %v1050_v10, %v740_v12 }
 0x302   :  { %v742_v15 = vpop.f32.mrf.mxu1 }
 0x303   :  { %v752_v16 = vmul.f32 %v750_v14, %v750_v14  ;;  %v743_v17 = vadd.f32 %v742_v15, %v653_v6 }
 0x304   :  { %v1190_v18 = vpop.f32.mrf.mxu1 }
 0x305   :  { %v754_v19 = vmul.f32 %v752_v16, %v750_v14  ;;  %v751_v20 = vadd.f32 %v1050_v10, %v743_v17 }
 0x307   :  { %v756_v22 = vmul.f32 0.044715, %v754_v19  ;;  %v753_v23 = vmul.f32 %v751_v20, %v751_v20 }
 0x309   :  { %v758_v24 = vadd.f32 %v756_v22, %v750_v14  ;;  %v755_v25 = vmul.f32 %v753_v23, %v751_v20 }
 0x30b   :  { %v760_v26 = vmul.f32 0.7978846, %v758_v24  ;;  %v757_v27 = vmul.f32 0.044715, %v755_v25 }
 0x30d   :  { %1307 = vtanh.f32 %v760_v26  ;;  %v759_v28 = vadd.f32 %v757_v27, %v751_v20 }
 0x30f   :  { %v761_v29 = vmul.f32 0.7978846, %v759_v28 }
 0x311   :  { %1309 = vtanh.f32 %v761_v29 }
 0x31a   :  { %v1308_v30 = vpop.eup %1307 }
 0x31b   :  { %v764_v31 = vadd.f32 1.0, %v1308_v30 }
 0x31d   :  { %v766_v34 = vmul.f32 0.5, %v764_v31 }
 0x31e   :  { %v1310_v32 = vpop.eup %1309 }
 0x31f   :  { %v765_v33 = vadd.f32 1.0, %v1310_v32  ;;  %v768_v36 = vmul.f32 %v766_v34, %v750_v14 }
 0x321   :  { %v767_v35 = vmul.f32 0.5, %v765_v33 }
 0x323   :  { %v769_v37 = vmul.f32 %v767_v35, %v751_v20 }
 0x325   :  { %v770_v38 = vpack.c.bf16 %v769_v37, %v768_v36 }
 0x327   :  { %1208 = vmatmul.mubr.bf16.vlgmr.msra.gmra.mxu0 %v770_v38 }
 0x3e7   :  { %v857_v48 = vpop.f32.mrf.mxu0 }
 0x3e8   :  { %v858_v49 = vadd.f32 %v1051_v47, %v857_v48 }
 0x3e9   :  { %v1209_v50 = vpop.f32.mrf.mxu0 }
 0x3ea   :  { %v864_v51 = vmul.f32 %v858_v49, %v858_v49 }
 0x3eb   :  { %v860_v52 = vpop.f32.mrf.mxu0 }
 0x3ec   :  { %v866_v53 = vmul.f32 %v864_v51, %v858_v49  ;;  %v861_v54 = vadd.f32 %v1051_v47, %v860_v52 }
 0x3ed   :  { %v1210_v55 = vpop.f32.mrf.mxu0 }
 0x3ee   :  { %v868_v56 = vmul.f32 0.044715, %v866_v53  ;;  %v865_v57 = vmul.f32 %v861_v54, %v861_v54 }
 0x3f0   :  { %v870_v58 = vadd.f32 %v868_v56, %v858_v49  ;;  %v867_v59 = vmul.f32 %v865_v57, %v861_v54 }
 0x3f2   :  { %v872_v60 = vmul.f32 0.7978846, %v870_v58  ;;  %v869_v61 = vmul.f32 0.044715, %v867_v59 }
 0x3f4   :  { %1311 = vtanh.f32 %v872_v60  ;;  %v871_v62 = vadd.f32 %v869_v61, %v861_v54 }
 0x3f6   :  { %v873_v21 = vmul.f32 0.7978846, %v871_v62 }
 0x3f8   :  { %1313 = vtanh.f32 %v873_v21 }
 0x401   :  { %v1312_v63 = vpop.eup %1311 }
 0x402   :  { %v876_v0 = vadd.f32 1.0, %v1312_v63 }
 0x404   :  { %v878_v2 = vmul.f32 0.5, %v876_v0 }
 0x405   :  { %v1314_v1 = vpop.eup %1313 }
 0x406   :  { %v877_v3 = vadd.f32 1.0, %v1314_v1  ;;  %v880_v5 = vmul.f32 %v878_v2, %v858_v49 }
 0x408   :  { %v879_v4 = vmul.f32 0.5, %v877_v3 }
 0x40a   :  { %v881_v6 = vmul.f32 %v879_v4, %v861_v54 }
 0x40c   :  { %v882_v7 = vpack.c.bf16 %v881_v6, %v880_v5 }
 0x40e   :  { %1228 = vmatmul.mubr.bf16.vlgmr.msra.gmra.mxu1 %v882_v7 }
 0x4ce   :  { %v969_v9 = vpop.f32.mrf.mxu1 }
 0x4cf   :  { %v970_v10 = vadd.f32 %v1060_v8, %v969_v9 }
 0x4d0   :  { %v1229_v11 = vpop.f32.mrf.mxu1 }
 0x4d1   :  { %976 = vst [vmem:[#allocation10 + $0x10] sm:$0xff] %v970_v10 }
 0x4d2   :  { %v972_v12 = vpop.f32.mrf.mxu1 }
 0x4d3   :  { %v973_v13 = vadd.f32 %v1060_v8, %v972_v12 }
 0x4d4   :  { %v1230_v14 = vpop.f32.mrf.mxu1 }
 0x4d5   :  { %977 = vst [vmem:[#allocation10 + $0x18] sm:$0xff] %v973_v13 }
 0x4d6   :  { %1406 = shalt.err (!%p1403_p10)
}
 0x4d7   :  { %991 = dma.vmem_to_hbm [thread:$0]  %s986_s3, 768, %s1551_s4, [#allocation4], %s1425_s20, %s1425_s20, %s1426_s21  }
 0x4d8   :  { %1421 = dma.done.wait [#allocation4], 768  }
 0x4d9   :  { %1422 = vsyncadd [#allocation4], 4294966528 }
 0x4da   :  { %995 = vsyncpa [#allocation3], 1 }
 0x4db   :  { %996 = vsyncpa [#allocation6], 1 }
 0x4dc   :  { %997 = vsyncpa [#allocation9], 1 }
 0x4dd   :  { %998 = vsyncpa [#allocation4], 1 }

</bundles_post_ra>
